<compile_context>
chip_gen: v7x
topology: tpu7x:2x2x1
jax: 0.10.0
libtpu: 0.0.40
codegen_flags: <defaults>
</compile_context>

<pallas_src>
import numpy as np
import jax
import jax.numpy as jnp
from jax import lax
from jax.experimental import pallas as pl
from jax.experimental.pallas import tpu as pltpu


def _round_up(n, m):
    return ((n + m - 1) // m) * m


def _elu(x):
    # ELU(alpha=1): x if x > 0 else exp(x) - 1 (clamp exp arg on the dead branch)
    return jnp.where(x > 0, x, jnp.exp(jnp.minimum(x, 0.0)) - 1.0)


def _forward_kernel(x_ref, w_ref, o_ref):
    x = x_ref[...]                      # [TB, 16]  packed per-sample inputs
    w = w_ref[...]                      # [16, 128] packed weights

    tb = x.shape[0]
    r0 = x[:, 0:6]                      # [TB, 6]  board row 0
    r1 = x[:, 6:12]                     # [TB, 6]  board row 1
    sc = x[:, 12:14]                    # [TB, 2]  scores

    cw = w[0:1, :]                      # [1,128] conv1 weight duplicated in both halves
    cb = w[1:2, :]                      # [1,128] conv1 bias duplicated
    w2 = w[2:3, :]                      # [1,128] conv2 weight [row0 chans | row1 chans]
    c2b = w[3:4, 0:1]                   # [1,1]   conv2 bias
    wh_y = w[4:10, 0:8]                 # [6,8]   folded head weights (y -> [p(6)|v|pad])
    wh_s = w[10:12, 0:8]                # [2,8]   folded head weights (scores -> ...)
    bh = w[12:13, 0:8]                  # [1,8]   folded head bias

    # --- Conv2d(1,64,(1,1)) + ELU on a full 128-lane layout -----------------
    # lane l < 64  : channel l,     H-row 0
    # lane l >= 64 : channel l-64,  H-row 1
    lane = lax.broadcasted_iota(jnp.int32, (tb, 6, 128), 2)
    xin = jnp.where(lane < 64, r0[:, :, None], r1[:, :, None])        # [TB,6,128]
    e = _elu(xin * cw[None, :, :] + cb[None, :, :])                   # [TB,6,128]

    # --- Conv2d(64,1,(2,1)) + ELU : single 128-lane (XLU) reduction ---------
    y = _elu(jnp.sum(e * w2[None, :, :], axis=-1) + c2b)              # [TB, 6]

    # --- Folded heads: (Linear(6,128) ; Linear(2,2)) o Linear(130, 6|1) -----
    head = (jnp.dot(y, wh_y, preferred_element_type=jnp.float32)
            + jnp.dot(sc, wh_s, preferred_element_type=jnp.float32)
            + bh)                                                     # [TB, 8]

    # --- Masked softmax over policy lanes 0..5; lane 6 = value; lane 7 pad --
    col = lax.broadcasted_iota(jnp.int32, head.shape, 1)
    is_p = col < 6
    logits = jnp.where(is_p, head, -1e30)
    m = jnp.max(logits, axis=1, keepdims=True)
    ex = jnp.exp(logits - m)
    denom = jnp.sum(ex, axis=1, keepdims=True)
    inv = pl.reciprocal(denom, approx=True)
    inv = inv * (2.0 - denom * inv)     # one Newton step -> ~f32 accuracy, still EUP path
    p = ex * inv

    # Single packed store: [p(6) | v(1) | 0]
    o_ref[...] = jnp.where(is_p, p, jnp.where(col == 6, head, 0.0))


def init_params(key):
    """Deterministic init in PyTorch parameter shapes."""
    ks = jax.random.split(key, 12)

    def u(k, shape, fan_in):
        b = 1.0 / np.sqrt(fan_in)
        return jax.random.uniform(k, shape, jnp.float32, -b, b)

    return {
        "conv1_w": u(ks[0], (64, 1, 1, 1), 1),     # Conv2d(1, 64, (1,1))
        "conv1_b": u(ks[1], (64,), 1),
        "conv2_w": u(ks[2], (1, 64, 2, 1), 128),   # Conv2d(64, 1, (2,1))
        "conv2_b": u(ks[3], (1,), 128),
        "lin_w":   u(ks[4], (128, 6), 6),          # Linear(6, 128)
        "lin_b":   u(ks[5], (128,), 6),
        "simple_w": u(ks[6], (2, 2), 2),           # Linear(2, 2)
        "simple_b": u(ks[7], (2,), 2),
        "p_w":     u(ks[8], (6, 130), 130),        # Linear(130, 6)
        "p_b":     u(ks[9], (6,), 130),
        "v_w":     u(ks[10], (1, 130), 130),       # Linear(130, 1)
        "v_b":     u(ks[11], (1,), 130),
    }


def state_to_tensor_np(ss):
    """Pure-python/numpy glue mirroring algorithm/nets.py::state_to_tensor."""
    scores, states = [], []
    if not isinstance(ss, list):
        ss = [ss]
    for s in ss:
        row1 = np.flip(np.copy(s[1, :-1]))
        row2 = np.copy(s[0, :-1])
        states.append(np.array([[row1, row2]]))
        scores.append([s[1, -1], s[0, -1]])
    return (jnp.asarray(np.array(scores), dtype=jnp.float32),   # [B, 2]
            jnp.asarray(np.array(states), dtype=jnp.float32))   # [B, 1, 2, 6]


def _pack_weights(params):
    """Host-side (one-time) algebraic folding + packing into a single [16,128] slab."""
    c1w = params["conv1_w"].reshape(64)
    c1b = params["conv1_b"]
    c2w = params["conv2_w"][0, :, :, 0]            # [64, 2]
    c2w0, c2w1 = c2w[:, 0], c2w[:, 1]
    c2b = params["conv2_b"][0]

    linw_t = params["lin_w"].T                     # [6, 128]
    lin_b = params["lin_b"]                        # [128]
    pw_t = params["p_w"].T                         # [130, 6]
    vw_t = params["v_w"].T                         # [130, 1]
    sw_t = params["simple_w"].T                    # [2, 2]
    sb = params["simple_b"]                        # [2]

    # Fold Linear(6,128) and Linear(2,2) into the classifier heads.
    wp_eff = linw_t @ pw_t[:128]                   # [6, 6]
    wv_eff = linw_t @ vw_t[:128]                   # [6, 1]
    sp_eff = sw_t @ pw_t[128:]                     # [2, 6]
    sv_eff = sw_t @ vw_t[128:]                     # [2, 1]
    bp = lin_b @ pw_t[:128] + params["p_b"] + sb @ pw_t[128:]   # [6]
    bv = lin_b @ vw_t[:128] + params["v_b"] + sb @ vw_t[128:]   # [1]

    wslab = jnp.zeros((16, 128), jnp.float32)
    wslab = wslab.at[0, 0:64].set(c1w).at[0, 64:128].set(c1w)
    wslab = wslab.at[1, 0:64].set(c1b).at[1, 64:128].set(c1b)
    wslab = wslab.at[2, 0:64].set(c2w0).at[2, 64:128].set(c2w1)
    wslab = wslab.at[3, 0].set(c2b)
    wslab = wslab.at[4:10, 0:6].set(wp_eff)
    wslab = wslab.at[4:10, 6].set(wv_eff[:, 0])
    wslab = wslab.at[10:12, 0:6].set(sp_eff)
    wslab = wslab.at[10:12, 6].set(sv_eff[:, 0])
    wslab = wslab.at[12, 0:6].set(bp)
    wslab = wslab.at[12, 6].set(bv[0])
    return wslab


def neural_network_forward(scores, state, params):
    """scores: [B, 2] f32, state: [B, 1, 2, 6] f32 (NCHW). Returns (p [B,6], v [B,1])."""
    B = scores.shape[0]

    # Batch tiling: TB sublane-aligned; per-tile VMEM footprint (few hundred KiB)
    # is far inside the scoped-VMEM default on v5e/v6e/v7x.
    TB = min(128, _round_up(B, 8))
    B_pad = _round_up(B, TB)

    # Pack all per-sample inputs into one [B_pad, 16] slab (1 DMA instead of 3).
    r0 = state[:, 0, 0, :]                               # [B, 6]
    r1 = state[:, 0, 1, :]                               # [B, 6]
    x = jnp.zeros((B_pad, 16), jnp.float32)
    x = x.at[:B, 0:6].set(r0).at[:B, 6:12].set(r1).at[:B, 12:14].set(scores)

    wslab = _pack_weights(params)                        # [16, 128] (1 DMA, re-used)

    out = pl.pallas_call(
        _forward_kernel,
        out_shape=jax.ShapeDtypeStruct((B_pad, 8), jnp.float32),
        grid=(B_pad // TB,),
        in_specs=[pl.BlockSpec((TB, 16), lambda i: (i, 0)),
                  pl.BlockSpec((16, 128), lambda i: (0, 0))],
        out_specs=pl.BlockSpec((TB, 8), lambda i: (i, 0)),
        compiler_params=pltpu.CompilerParams(dimension_semantics=("parallel",)),
    )(x, wslab)

    p = out[:B, 0:6]
    v = out[:B, 6:7]
    return p, v


def reference_forward(scores, state, params):
    """Plain-JAX reference of the PyTorch forward (for validation)."""
    w1 = params["conv1_w"].reshape(64)
    b1 = params["conv1_b"]
    h = (state[:, 0, None, :, :] * w1[None, :, None, None]
         + b1[None, :, None, None])                      # [B, 64, 2, 6]
    h = _elu(h)
    w2 = params["conv2_w"][0, :, :, 0]                   # [64, 2]
    y = jnp.einsum("bchw,ch->bw", h, w2) + params["conv2_b"][0]
    y = _elu(y)                                          # [B, 6]
    x1 = y @ params["lin_w"].T + params["lin_b"]         # [B, 128]
    x2 = scores @ params["simple_w"].T + params["simple_b"]
    xc = jnp.concatenate([x1, x2], axis=1)               # [B, 130]
    p = jax.nn.softmax(xc @ params["p_w"].T + params["p_b"], axis=1)
    v = xc @ params["v_w"].T + params["v_b"]
    return p, v


if __name__ == "__main__":
    key = jax.random.PRNGKey(0)
    pkey, skey = jax.random.split(key)
    params = init_params(pkey)

    # B=2 synthetic "game states": each is a (2, 7) array (6 board cells + score).
    raw = np.asarray(jax.random.randint(skey, (2, 2, 7), 0, 10), dtype=np.float32)
    ss = [raw[i] for i in range(2)]

    scores, state = state_to_tensor_np(ss)               # [2, 2], [2, 1, 2, 6]

    p, v = neural_network_forward(scores, state, params)
    jax.block_until_ready((p, v))

    p_ref, v_ref = reference_forward(scores, state, params)
    assert p.shape == (2, 6) and v.shape == (2, 1)
    assert np.allclose(np.asarray(p), np.asarray(p_ref), atol=1e-4), "policy mismatch"
    assert np.allclose(np.asarray(v), np.asarray(v_ref), atol=1e-4), "value mismatch"
    assert np.allclose(np.asarray(p).sum(axis=1), 1.0, atol=1e-4), "softmax not normalized"

    print("KERNEL_OK")
</pallas_src>

<mosaic_0001>
module attributes {stable_mosaic.version = 11 : i64} {
  func.func @_forward_kernel(%arg0: i32, %arg1: memref<8x16xf32, #tpu.memory_space<vmem>>, %arg2: memref<16x128xf32, #tpu.memory_space<vmem>>, %arg3: memref<8x8xf32, #tpu.memory_space<vmem>>) attributes {dimension_semantics = [#tpu.dimension_semantics<parallel>], iteration_bounds = array<i64: 1>, scalar_prefetch = 0 : i64, scratch_operands = 0 : i64, tpu.core_type = #tpu.core_type<tc>, window_params = [{transform_indices = @transform_0, window_bounds = array<i64: 8, 16>}, {pipeline_mode = #tpu.pipeline_mode<synchronous>, transform_indices = @transform_1, window_bounds = array<i64: 16, 128>}, {transform_indices = @transform_2, window_bounds = array<i64: 8, 8>}]} {
    %c0 = arith.constant 0 : index
    %c0_0 = arith.constant 0 : index
    %0 = vector.load %arg1[%c0, %c0_0] : memref<8x16xf32, #tpu.memory_space<vmem>>, vector<8x16xf32>
    %c0_1 = arith.constant 0 : index
    %c0_2 = arith.constant 0 : index
    %1 = vector.load %arg2[%c0_1, %c0_2] : memref<16x128xf32, #tpu.memory_space<vmem>>, vector<16x128xf32>
    %2 = vector.extract_strided_slice %0 {offsets = [0, 0], sizes = [8, 6], strides = [1, 1]} : vector<8x16xf32> to vector<8x6xf32>
    %3 = vector.extract_strided_slice %0 {offsets = [0, 6], sizes = [8, 6], strides = [1, 1]} : vector<8x16xf32> to vector<8x6xf32>
    %4 = vector.extract_strided_slice %0 {offsets = [0, 12], sizes = [8, 2], strides = [1, 1]} : vector<8x16xf32> to vector<8x2xf32>
    %5 = vector.extract_strided_slice %1 {offsets = [0, 0], sizes = [1, 128], strides = [1, 1]} : vector<16x128xf32> to vector<1x128xf32>
    %6 = vector.extract_strided_slice %1 {offsets = [1, 0], sizes = [1, 128], strides = [1, 1]} : vector<16x128xf32> to vector<1x128xf32>
    %7 = vector.extract_strided_slice %1 {offsets = [2, 0], sizes = [1, 128], strides = [1, 1]} : vector<16x128xf32> to vector<1x128xf32>
    %8 = vector.extract_strided_slice %1 {offsets = [3, 0], sizes = [1, 1], strides = [1, 1]} : vector<16x128xf32> to vector<1x1xf32>
    %9 = vector.extract_strided_slice %1 {offsets = [4, 0], sizes = [6, 8], strides = [1, 1]} : vector<16x128xf32> to vector<6x8xf32>
    %10 = vector.extract_strided_slice %1 {offsets = [10, 0], sizes = [2, 8], strides = [1, 1]} : vector<16x128xf32> to vector<2x8xf32>
    %11 = vector.extract_strided_slice %1 {offsets = [12, 0], sizes = [1, 8], strides = [1, 1]} : vector<16x128xf32> to vector<1x8xf32>
    %12 = tpu.iota {dimensions = array<i32: 2>} : vector<8x6x128xi32>
    %c64_i32 = arith.constant 64 : i32
    %13 = vector.broadcast %c64_i32 : i32 to vector<8x6x128xi32>
    %14 = arith.cmpi slt, %12, %13 : vector<8x6x128xi32>
    %15 = vector.shape_cast %2 : vector<8x6xf32> to vector<8x6x1xf32>
    %16 = vector.shape_cast %3 : vector<8x6xf32> to vector<8x6x1xf32>
    %17 = vector.shape_cast %15 : vector<8x6x1xf32> to vector<8x6x1xf32>
    %18 = vector.broadcast %17 : vector<8x6x1xf32> to vector<8x6x128xf32>
    %19 = vector.shape_cast %16 : vector<8x6x1xf32> to vector<8x6x1xf32>
    %20 = vector.broadcast %19 : vector<8x6x1xf32> to vector<8x6x128xf32>
    %21 = arith.select %14, %18, %20 : vector<8x6x128xi1>, vector<8x6x128xf32>
    %22 = vector.shape_cast %5 : vector<1x128xf32> to vector<1x1x128xf32>
    %23 = vector.broadcast %22 : vector<1x1x128xf32> to vector<8x6x128xf32>
    %24 = arith.mulf %21, %23 : vector<8x6x128xf32>
    %25 = vector.shape_cast %6 : vector<1x128xf32> to vector<1x1x128xf32>
    %26 = vector.broadcast %25 : vector<1x1x128xf32> to vector<8x6x128xf32>
    %27 = arith.addf %24, %26 : vector<8x6x128xf32>
    %cst = arith.constant 0.000000e+00 : f32
    %28 = vector.broadcast %cst : f32 to vector<8x6x128xf32>
    %29 = arith.cmpf ogt, %27, %28 : vector<8x6x128xf32>
    %cst_3 = arith.constant 0.000000e+00 : f32
    %30 = vector.broadcast %cst_3 : f32 to vector<8x6x128xf32>
    %31 = arith.minimumf %27, %30 : vector<8x6x128xf32>
    %32 = math.exp %31 : vector<8x6x128xf32>
    %cst_4 = arith.constant 1.000000e+00 : f32
    %33 = vector.broadcast %cst_4 : f32 to vector<8x6x128xf32>
    %34 = arith.subf %32, %33 : vector<8x6x128xf32>
    %35 = arith.select %29, %27, %34 : vector<8x6x128xi1>, vector<8x6x128xf32>
    %36 = vector.shape_cast %7 : vector<1x128xf32> to vector<1x1x128xf32>
    %37 = vector.broadcast %36 : vector<1x1x128xf32> to vector<8x6x128xf32>
    %38 = arith.mulf %35, %37 : vector<8x6x128xf32>
    %cst_5 = arith.constant dense<0.000000e+00> : vector<8x6xf32>
    %39 = vector.multi_reduction <add>, %38, %cst_5 [2] : vector<8x6x128xf32> to vector<8x6xf32>
    %40 = vector.broadcast %8 : vector<1x1xf32> to vector<8x6xf32>
    %41 = arith.addf %39, %40 : vector<8x6xf32>
    %cst_6 = arith.constant 0.000000e+00 : f32
    %42 = vector.broadcast %cst_6 : f32 to vector<8x6xf32>
    %43 = arith.cmpf ogt, %41, %42 : vector<8x6xf32>
    %cst_7 = arith.constant 0.000000e+00 : f32
    %44 = vector.broadcast %cst_7 : f32 to vector<8x6xf32>
    %45 = arith.minimumf %41, %44 : vector<8x6xf32>
    %46 = math.exp %45 : vector<8x6xf32>
    %cst_8 = arith.constant 1.000000e+00 : f32
    %47 = vector.broadcast %cst_8 : f32 to vector<8x6xf32>
    %48 = arith.subf %46, %47 : vector<8x6xf32>
    %49 = arith.select %43, %41, %48 : vector<8x6xi1>, vector<8x6xf32>
    %cst_9 = arith.constant dense<0.000000e+00> : vector<8x8xf32>
    %50 = tpu.matmul %49, %9, %cst_9 {dimension_numbers = #tpu.dot_dimension_numbers<[1], [0], [0], [1], [0, 0, 1, 1], [], []>} : vector<8x6xf32>, vector<6x8xf32>, vector<8x8xf32> -> vector<8x8xf32>
    %cst_10 = arith.constant dense<0.000000e+00> : vector<8x8xf32>
    %51 = tpu.matmul %4, %10, %cst_10 {dimension_numbers = #tpu.dot_dimension_numbers<[1], [0], [0], [1], [0, 0, 1, 1], [], []>} : vector<8x2xf32>, vector<2x8xf32>, vector<8x8xf32> -> vector<8x8xf32>
    %52 = arith.addf %50, %51 : vector<8x8xf32>
    %53 = vector.broadcast %11 : vector<1x8xf32> to vector<8x8xf32>
    %54 = arith.addf %52, %53 : vector<8x8xf32>
    %55 = tpu.iota {dimensions = array<i32: 1>} : vector<8x8xi32>
    %c6_i32 = arith.constant 6 : i32
    %56 = vector.broadcast %c6_i32 : i32 to vector<8x8xi32>
    %57 = arith.cmpi slt, %55, %56 : vector<8x8xi32>
    %cst_11 = arith.constant -1.000000e+30 : f32
    %58 = vector.broadcast %cst_11 : f32 to vector<8x8xf32>
    %59 = arith.select %57, %54, %58 : vector<8x8xi1>, vector<8x8xf32>
    %cst_12 = arith.constant dense<0xFF800000> : vector<8xf32>
    %60 = vector.multi_reduction <maximumf>, %59, %cst_12 [1] : vector<8x8xf32> to vector<8xf32>
    %61 = vector.shape_cast %60 : vector<8xf32> to vector<8x1xf32>
    %62 = vector.broadcast %61 : vector<8x1xf32> to vector<8x8xf32>
    %63 = arith.subf %59, %62 : vector<8x8xf32>
    %64 = math.exp %63 : vector<8x8xf32>
    %cst_13 = arith.constant dense<0.000000e+00> : vector<8xf32>
    %65 = vector.multi_reduction <add>, %64, %cst_13 [1] : vector<8x8xf32> to vector<8xf32>
    %66 = vector.shape_cast %65 : vector<8xf32> to vector<8x1xf32>
    %67 = tpu.reciprocal %66 {approx = true} : vector<8x1xf32> -> vector<8x1xf32>
    %68 = arith.mulf %66, %67 : vector<8x1xf32>
    %cst_14 = arith.constant 2.000000e+00 : f32
    %69 = vector.broadcast %cst_14 : f32 to vector<8x1xf32>
    %70 = arith.subf %69, %68 : vector<8x1xf32>
    %71 = arith.mulf %67, %70 : vector<8x1xf32>
    %72 = vector.broadcast %71 : vector<8x1xf32> to vector<8x8xf32>
    %73 = arith.mulf %64, %72 : vector<8x8xf32>
    %c6_i32_15 = arith.constant 6 : i32
    %74 = vector.broadcast %c6_i32_15 : i32 to vector<8x8xi32>
    %75 = arith.cmpi eq, %55, %74 : vector<8x8xi32>
    %cst_16 = arith.constant 0.000000e+00 : f32
    %76 = vector.broadcast %cst_16 : f32 to vector<8x8xf32>
    %77 = arith.select %75, %54, %76 : vector<8x8xi1>, vector<8x8xf32>
    %78 = arith.select %57, %73, %77 : vector<8x8xi1>, vector<8x8xf32>
    %c0_17 = arith.constant 0 : index
    %c0_18 = arith.constant 0 : index
    %79 = vector.load %arg3[%c0_17, %c0_18] : memref<8x8xf32, #tpu.memory_space<vmem>>, vector<8x8xf32>
    tpu.vector_store %arg3[%c0_17, %c0_18], %78 {strides = array<i32>} : memref<8x8xf32, #tpu.memory_space<vmem>>, vector<8x8xf32>,
    return
  }
  func.func @transform_0(%arg0: i32) -> (i32, i32) {
    %c0_i32 = arith.constant 0 : i32
    %c0_i32_0 = arith.constant 0 : i32
    return %arg0, %c0_i32 : i32, i32
  }
  func.func @transform_1(%arg0: i32) -> (i32, i32) {
    %c0_i32 = arith.constant 0 : i32
    %c0_i32_0 = arith.constant 0 : i32
    %c0_i32_1 = arith.constant 0 : i32
    return %c0_i32, %c0_i32_0 : i32, i32
  }
  func.func @transform_2(%arg0: i32) -> (i32, i32) {
    %c0_i32 = arith.constant 0 : i32
    %c0_i32_0 = arith.constant 0 : i32
    return %arg0, %c0_i32 : i32, i32
  }
}

</mosaic_0001>

<bundles_post_ra>
// kernel: tpu_custom_call.1
= control target key start
LH: loop header
LB: loop body
LE: loop exit
PB: predicated region body
PF: predicated region fallthrough
CT: control target
= control target key end

     0   :  { %7 = vsyncpa [#allocation3], 0  ;;  %s894_s0 = inlined_call_operand.hbm [shape: f32[8,16], index: 0, kind: input, shape index: {}]   ;;  %s895_s1 = inlined_call_operand.hbm [shape: f32[16,128], index: 1, kind: input, shape index: {}]   ;;  %s896_s2 = inlined_call_operand.hbm [shape: f32[8,8], index: 2, kind: output, shape index: {}]  }
   0x1   :  { %8 = vsyncpa [#allocation6], 0 }
   0x2   :  { %9 = vsyncpa [#allocation4], 0  ;;  %s718_s9 = smov [#allocation2]   ;;  %s719_s11 = smov [#allocation5]  }
   0x3   :  { %s16_s10 = sshll.u32 %s718_s9, 4  ;;  %s25_s12 = sshll.u32 %s719_s11, 4  ;;  %s17_s10 = int_to_ptr.vmem [resolvable:$true] %s16_s10  ;;  %s741_s12 = int_to_ptr.vmem [resolvable:$true] %s25_s12 }
   0x4   :  { %s646_s15 = scalar_lea.hbm %s894_s0, 128 }
   0x5   :  { %p647_p0 = scmp.ne.s32.totalorder %s894_s0, %s646_s15  ;;  %p650_p1 = scmp.lt.u32.totalorder %s646_s15, %s894_s0 }
   0x7   :  { %p652_p2 = pnand %p650_p1, %p647_p0 }
   0x9   :  { %655 = shalt.err (!%p652_p2)
}
   0xa   :  { %s656_s20 = scalar_lea.vmem %s17_s10, 128  ;;  %p661_p4 = scmp.lt.s32.totalorder %s17_s10, %s17_s10 }
   0xb   :  { %p657_p3 = scmp.ne.s32.totalorder %s17_s10, %s656_s20  ;;  %p662_p5 = scmp.lt.s32.totalorder %s656_s20, %s656_s20 }
   0xd   :  { %p663_p6 = por %p662_p5, %p661_p4 }
   0xf   :  { %p664_p7 = pnand %p663_p6, %p657_p3 }
  0x11   :  { %667 = shalt.err (!%p664_p7)
}
  0x12   :  { %19 = dma.hbm_to_vmem [thread:$0]  %s894_s0, 128, %s17_s10, [#allocation3]  }
  0x13   :  { %s668_s25 = scalar_lea.hbm %s895_s1, 256 }
  0x14   :  { %p669_p8 = scmp.ne.s32.totalorder %s895_s1, %s668_s25  ;;  %p672_p9 = scmp.lt.u32.totalorder %s668_s25, %s895_s1 }
  0x16   :  { %p674_p10 = pnand %p672_p9, %p669_p8 }
  0x18   :  { %677 = shalt.err (!%p674_p10)
}
  0x19   :  { %s678_s30 = scalar_lea.vmem %s741_s12, 256  ;;  %p683_p12 = scmp.lt.s32.totalorder %s741_s12, %s741_s12 }
  0x1a   :  { %p679_p11 = scmp.ne.s32.totalorder %s741_s12, %s678_s30  ;;  %p684_p13 = scmp.lt.s32.totalorder %s678_s30, %s678_s30 }
  0x1c   :  { %p685_p0 = por %p684_p13, %p683_p12 }
  0x1e   :  { %p686_p1 = pnand %p685_p0, %p679_p11 }
  0x20   :  { %689 = shalt.err (!%p686_p1)
}
  0x21   :  { %s720_s0 = smov 128   ;;  %s721_s3 = smov 8  }
  0x22   :  { %31 = dma.hbm_to_vmem [thread:$0]  %s895_s1, 256, %s741_s12, [#allocation6], %s720_s0, %s720_s0, %s721_s3  }
  0x23   :  { %712 = dma.done.wait [#allocation3], 128  }
  0x24   :  { %713 = vsyncadd [#allocation3], 4294967168 }
  0x25   :  { %714 = dma.done.wait [#allocation6], 256  }
  0x26   :  { %715 = vsyncadd [#allocation6], 4294967040  ;;  %v41_v0 = vlaneseq  ;;  %v776_v4 = vld [vmem:[#allocation2] sm:$0xff]  ;;  %v796_v19 = vld [vmem:[#allocation5] sm:$0xff]  ;;  %vm224_vm2 = vcmask 1045504   ;;  %s722_s1 = smov 116  }
  0x27   :  { %v250_v20 = vrot.slane %v796_v19, 3  ;;  %vm318_vm10 = vcmask 1041408   ;;  %vm724_vm11 = vmmov 0   ;;  %vm445_vm12 = vcmask 1043456   ;;  %s725_s7 = smov [#allocation7]  }
  0x28   :  { %v772_v1 = vshrl.u32 %v41_v0, 7  ;;  %v799_v21 = vand.u32 127, %v41_v0  ;;  %vm315_vm13 = vcmask 15360   ;;  %s556_s8 = sshll.u32 %s725_s7, 4  ;;  %s557_s8 = int_to_ptr.vmem [resolvable:$true] %s556_s8 }
  0x29   :  { %600 = vpush %v250_v20  ;;  %s690_s9 = scalar_lea.vmem %s557_s8, 128  ;;  %p695_p3 = scmp.lt.s32.totalorder %s557_s8, %s557_s8 }
  0x2a   :  { %v46_v2 = vsub.s32 0, %v772_v1  ;;  %v53_v3 = vsub.s32 1, %v772_v1  ;;  %v60_v7 = vsub.s32 2, %v772_v1  ;;  %v67_v9 = vsub.s32 3, %v772_v1  ;;  %p691_p2 = scmp.ne.s32.totalorder %s557_s8, %s690_s9  ;;  %p696_p4 = scmp.lt.s32.totalorder %s690_s9, %s690_s9 }
  0x2b   :  { %v74_v11 = vsub.s32 4, %v772_v1  ;;  %v81_v13 = vsub.s32 5, %v772_v1  ;;  %v88_v15 = vsub.s32 6, %v772_v1  ;;  %v95_v17 = vsub.s32 7, %v772_v1 }
  0x2c   :  { %v47_v5 = vrot.slane %v776_v4, %v46_v2  ;;  %v54_v6 = vrot.slane %v776_v4, %v53_v3  ;;  %v61_v8 = vrot.slane %v776_v4, %v60_v7  ;;  %v68_v10 = vrot.slane %v776_v4, %v67_v9  ;;  %p697_p5 = por %p696_p4, %p695_p3 }
  0x2d   :  { %v75_v12 = vrot.slane %v776_v4, %v74_v11  ;;  %v82_v14 = vrot.slane %v776_v4, %v81_v13  ;;  %v89_v16 = vrot.slane %v776_v4, %v88_v15  ;;  %v96_v18 = vrot.slane %v776_v4, %v95_v17 }
  0x2e   :  { %102 = vbcast.lane.b32.xlu1 %v47_v5, 262  ;;  %49 = vbcast.lane.b32.xlu0 %v47_v5, 256  ;;  %v802_v22 = vrot.slane %v796_v19, %v46_v2  ;;  %vm43_vm0 = vcmp.lt.s32.totalorder %v799_v21, 64  ;;  %v806_v23 = vrot.slane %v796_v19, %v53_v3  ;;  %v830_v56 = vrot.slane %v796_v19, %v60_v7  ;;  %p698_p6 = pnand %p697_p5, %p691_p2 }
  0x32   :  { %106 = vbcast.lane.b32.xlu1 %v54_v6, 262  ;;  %56 = vbcast.lane.b32.xlu0 %v54_v6, 256 }
  0x36   :  { %110 = vbcast.lane.b32.xlu1 %v61_v8, 262  ;;  %63 = vbcast.lane.b32.xlu0 %v61_v8, 256 }
  0x3a   :  { %114 = vbcast.lane.b32.xlu1 %v68_v10, 262  ;;  %70 = vbcast.lane.b32.xlu0 %v68_v10, 256 }
  0x3e   :  { %118 = vbcast.lane.b32.xlu1 %v75_v12, 262  ;;  %77 = vbcast.lane.b32.xlu0 %v75_v12, 256 }
  0x42   :  { %122 = vbcast.lane.b32.xlu1 %v82_v14, 262  ;;  %84 = vbcast.lane.b32.xlu0 %v82_v14, 256 }
  0x46   :  { %126 = vbcast.lane.b32.xlu1 %v89_v16, 262  ;;  %91 = vbcast.lane.b32.xlu0 %v89_v16, 256 }
  0x4a   :  { %130 = vbcast.lane.b32.xlu1 %v96_v18, 262  ;;  %98 = vbcast.lane.b32.xlu0 %v96_v18, 256 }
  0x5a   :  { %s601_s6 = spop %600 }
  0xa0   :  { %v103_v24 = vpop.permute.xlu1 %102  ;;  %v50_v25 = vpop.permute.xlu0 %49 }
  0xa1   :  { %v132_v26 = vsel %vm43_vm0, %v50_v25, %v103_v24 }
  0xa2   :  { %v144_v27 = vmul.f32 %v802_v22, %v132_v26 }
  0xa4   :  { %v156_v28 = vadd.f32 %v806_v23, %v144_v27  ;;  %v107_v29 = vpop.permute.xlu1 %106  ;;  %v57_v30 = vpop.permute.xlu0 %56 }
  0xa5   :  { %v133_v31 = vsel %vm43_vm0, %v57_v30, %v107_v29 }
  0xa6   :  { %v172_v32 = vmin.f32 %v156_v28, 0.0  ;;  %v145_v33 = vmul.f32 %v802_v22, %v133_v31  ;;  %vm164_vm1 = vcmp.gt.f32.partialorder %v156_v28, 0.0 }
  0xa8   :  { %v180_v34 = vmul.f32 1.442695, %v172_v32  ;;  %v157_v35 = vadd.f32 %v806_v23, %v145_v33  ;;  %v111_v36 = vpop.permute.xlu1 %110  ;;  %v64_v37 = vpop.permute.xlu0 %63 }
  0xa9   :  { %v134_v38 = vsel %vm43_vm0, %v64_v37, %v111_v36 }
  0xaa   :  { %610 = vpow2.f32 %v180_v34  ;;  %v173_v39 = vmin.f32 %v157_v35, 0.0  ;;  %v146_v40 = vmul.f32 %v802_v22, %v134_v38  ;;  %vm165_vm3 = vcmp.gt.f32.partialorder %v157_v35, 0.0 }
  0xac   :  { %v182_v41 = vmul.f32 1.442695, %v173_v39  ;;  %v158_v42 = vadd.f32 %v806_v23, %v146_v40  ;;  %v115_v43 = vpop.permute.xlu1 %114  ;;  %v71_v44 = vpop.permute.xlu0 %70 }
  0xad   :  { %v135_v45 = vsel %vm43_vm0, %v71_v44, %v115_v43 }
  0xae   :  { %612 = vpow2.f32 %v182_v41  ;;  %v174_v46 = vmin.f32 %v158_v42, 0.0  ;;  %v147_v47 = vmul.f32 %v802_v22, %v135_v45  ;;  %vm166_vm4 = vcmp.gt.f32.partialorder %v158_v42, 0.0 }
  0xb0   :  { %v184_v48 = vmul.f32 1.442695, %v174_v46  ;;  %v159_v49 = vadd.f32 %v806_v23, %v147_v47  ;;  %v119_v50 = vpop.permute.xlu1 %118  ;;  %v78_v51 = vpop.permute.xlu0 %77 }
  0xb1   :  { %v136_v52 = vsel %vm43_vm0, %v78_v51, %v119_v50 }
  0xb2   :  { %614 = vpow2.f32 %v184_v48  ;;  %v175_v53 = vmin.f32 %v159_v49, 0.0  ;;  %v148_v54 = vmul.f32 %v802_v22, %v136_v52  ;;  %vm167_vm5 = vcmp.gt.f32.partialorder %v159_v49, 0.0 }
  0xb4   :  { %v611_v55 = vpop.eup %610  ;;  %v186_v57 = vmul.f32 1.442695, %v175_v53  ;;  %v160_v58 = vadd.f32 %v806_v23, %v148_v54  ;;  %v123_v59 = vpop.permute.xlu1 %122 }
  0xb5   :  { %v85_v60 = vpop.permute.xlu0 %84  ;;  %v566_v62 = vadd.f32 -1.0, %v611_v55 }
  0xb6   :  { %v137_v61 = vsel %vm43_vm0, %v85_v60, %v123_v59  ;;  %616 = vpow2.f32 %v186_v57  ;;  %v176_v63 = vmin.f32 %v160_v58, 0.0  ;;  %vm168_vm6 = vcmp.gt.f32.partialorder %v160_v58, 0.0 }
  0xb7   :  { %v149_v0 = vmul.f32 %v802_v22, %v137_v61  ;;  %v204_v2 = vsel %vm164_vm1, %v156_v28, %v566_v62 }
  0xb8   :  { %v613_v3 = vpop.eup %612  ;;  %v188_v5 = vmul.f32 1.442695, %v176_v63  ;;  %v127_v7 = vpop.permute.xlu1 %126  ;;  %v216_v9 = vmul.f32 %v830_v56, %v204_v2  ;;  %v862_v63 = vld [vmem:[#allocation5 + $0x8] sm:$0xff]  ;;  %v723_v2 = vmov 0.0  }
  0xb9   :  { %v161_v6 = vadd.f32 %v806_v23, %v149_v0  ;;  %v92_v8 = vpop.permute.xlu0 %91  ;;  %v567_v12 = vadd.f32 -1.0, %v613_v3  ;;  %v314_v0 = vrot.slane %v862_v63, 2  ;;  %590 = vmatprep.subr.mxu0 %v723_v2  ;;  %592 = vmatprep.mubr.msk.f32.mxu0 %vm724_vm11, %v723_v2  ;;  %v446_v3 = vrot.slane %v796_v19, 4 }
  0xba   :  { %v138_v10 = vsel %vm43_vm0, %v92_v8, %v127_v7  ;;  %618 = vpow2.f32 %v188_v5  ;;  %v225_v15 = vsel %vm224_vm2, %v216_v9, 0.0  ;;  %595 = vmatprep.subr.mxu1 %v723_v2  ;;  %597 = vmatprep.mubr.msk.f32.mxu1 %vm724_vm11, %v723_v2  ;;  %vm441_vm11 = vcmask 1046534  }
  0xbb   :  { %v177_v13 = vmin.f32 %v161_v6, 0.0  ;;  %v150_v14 = vmul.f32 %v802_v22, %v138_v10  ;;  %226 = vadd.xlane.f32.xlu0 %v225_v15  ;;  %v205_v16 = vsel %vm165_vm3, %v157_v35, %v567_v12  ;;  %vm169_vm7 = vcmp.gt.f32.partialorder %v161_v6, 0.0  ;;  %591 = vmatpush3.msk.msra.mxu0 %vm318_vm10, %v314_v0 }
  0xbc   :  { %v615_v17 = vpop.eup %614  ;;  %v131_v24 = vpop.permute.xlu1 %130  ;;  %v217_v26 = vmul.f32 %v830_v56, %v205_v16 }
  0xbd   :  { %v190_v18 = vmul.f32 1.442695, %v177_v13  ;;  %v162_v20 = vadd.f32 %v806_v23, %v150_v14  ;;  %v99_v25 = vpop.permute.xlu0 %98  ;;  %v568_v28 = vadd.f32 -1.0, %v615_v17 }
  0xbe   :  { %v139_v27 = vsel %vm43_vm0, %v99_v25, %v131_v24  ;;  %v228_v31 = vsel %vm224_vm2, %v217_v26, 0.0 }
  0xbf   :  { %620 = vpow2.f32 %v190_v18  ;;  %v178_v29 = vmin.f32 %v162_v20, 0.0  ;;  %v151_v30 = vmul.f32 %v802_v22, %v139_v27  ;;  %229 = vadd.xlane.f32.xlu1 %v228_v31  ;;  %v206_v32 = vsel %vm166_vm4, %v158_v42, %v568_v28 }
  0xc0   :  { %v617_v33 = vpop.eup %616  ;;  %v218_v36 = vmul.f32 %v830_v56, %v206_v32  ;;  %vm170_vm8 = vcmp.gt.f32.partialorder %v162_v20, 0.0  ;;  %vm431_vm4 = vcmask 1041409  }
  0xc1   :  { %v192_v34 = vmul.f32 1.442695, %v178_v29  ;;  %v163_v35 = vadd.f32 %v806_v23, %v151_v30  ;;  %v569_v37 = vadd.f32 -1.0, %v617_v33 }
  0xc2   :  { %v231_v39 = vsel %vm224_vm2, %v218_v36, 0.0 }
  0xc3   :  { %622 = vpow2.f32 %v192_v34  ;;  %v179_v38 = vmin.f32 %v163_v35, 0.0  ;;  %232 = vadd.xlane.f32.xlu0 %v231_v39  ;;  %v207_v40 = vsel %vm167_vm5, %v159_v49, %v569_v37  ;;  %vm171_vm9 = vcmp.gt.f32.partialorder %v163_v35, 0.0 }
  0xc4   :  { %v619_v41 = vpop.eup %618  ;;  %v219_v43 = vmul.f32 %v830_v56, %v207_v40  ;;  %vm433_vm5 = vcmask 1042434  }
  0xc5   :  { %v194_v22 = vmul.f32 1.442695, %v179_v38  ;;  %v570_v44 = vadd.f32 -1.0, %v619_v41 }
  0xc6   :  { %v234_v42 = vsel %vm224_vm2, %v219_v43, 0.0 }
  0xc7   :  { %624 = vpow2.f32 %v194_v22  ;;  %235 = vadd.xlane.f32.xlu0 %v234_v42  ;;  %v208_v23 = vsel %vm168_vm6, %v160_v58, %v570_v44 }
  0xc8   :  { %v220_v46 = vmul.f32 %v830_v56, %v208_v23 }
  0xc9   :  { %v621_v45 = vpop.eup %620 }
  0xca   :  { %v571_v47 = vadd.f32 -1.0, %v621_v45  ;;  %v237_v48 = vsel %vm224_vm2, %v220_v46, 0.0 }
  0xcb   :  { %238 = vadd.xlane.f32.xlu1 %v237_v48 }
  0xcc   :  { %v209_v49 = vsel %vm169_vm7, %v161_v6, %v571_v47  ;;  %v252_v6 = vstv %s601_s6  ;;  %vm435_vm7 = vcmask 1043459  }
  0xcd   :  { %v623_v50 = vpop.eup %622  ;;  %v221_v51 = vmul.f32 %v830_v56, %v209_v49 }
  0xce   :  { %v572_v52 = vadd.f32 -1.0, %v623_v50 }
  0xcf   :  { %v240_v53 = vsel %vm224_vm2, %v221_v51, 0.0 }
  0xd0   :  { %241 = vadd.xlane.f32.xlu0 %v240_v53  ;;  %v210_v54 = vsel %vm170_vm8, %v162_v20, %v572_v52  ;;  %vm437_vm8 = vcmask 1044484  }
  0xd1   :  { %v625_v55 = vpop.eup %624  ;;  %v222_v57 = vmul.f32 %v830_v56, %v210_v54  ;;  %v401_v54 = vsub.s32 %v799_v21, %v772_v1 }
  0xd2   :  { %v573_v58 = vadd.f32 -1.0, %v625_v55 }
  0xd3   :  { %v243_v59 = vsel %vm224_vm2, %v222_v57, 0.0 }
  0xd4   :  { %244 = vadd.xlane.f32.xlu1 %v243_v59  ;;  %v211_v60 = vsel %vm171_vm9, %v163_v35, %v573_v58  ;;  %vm439_vm9 = vcmask 1045509  }
  0xd5   :  { %v223_v61 = vmul.f32 %v830_v56, %v211_v60  ;;  %v447_v56 = vrot.slane %v862_v63, 4 }
  0xd7   :  { %v246_v62 = vsel %vm224_vm2, %v223_v61, 0.0  ;;  %v448_v5 = vsel %vm445_vm12, %v446_v3, %v447_v56  ;;  %vm443_vm12 = vcmask 1047559  }
  0xd8   :  { %247 = vadd.xlane.f32.xlu0 %v246_v62  ;;  %596 = vmatpush3.msk.msra.mxu1 %vm224_vm2, %v448_v5 }
  0xe5   :  { %311 = vrot.lane.b32.xlu1 %v776_v4, %s722_s1 }
 0x148   :  { %v227_v4 = vpop.xlane.xlu0 %226 }
 0x149   :  { %v254_v8 = vadd.f32 %v252_v6, %v227_v4 }
 0x14b   :  { %v270_v13 = vmin.f32 %v254_v8, 0.0  ;;  %vm262_vm0 = vcmp.gt.f32.partialorder %v254_v8, 0.0 }
 0x14c   :  { %v230_v7 = vpop.xlane.xlu1 %229 }
 0x14d   :  { %v255_v10 = vadd.f32 %v252_v6, %v230_v7  ;;  %v278_v18 = vmul.f32 1.442695, %v270_v13 }
 0x14f   :  { %v271_v15 = vmin.f32 %v255_v10, 0.0  ;;  %626 = vpow2.f32 %v278_v18  ;;  %vm263_vm14 = vcmp.gt.f32.partialorder %v255_v10, 0.0 }
 0x150   :  { %v233_v9 = vpop.xlane.xlu0 %232 }
 0x151   :  { %v256_v12 = vadd.f32 %v252_v6, %v233_v9  ;;  %v280_v24 = vmul.f32 1.442695, %v271_v15 }
 0x153   :  { %v272_v16 = vmin.f32 %v256_v12, 0.0  ;;  %628 = vpow2.f32 %v280_v24  ;;  %vm264_vm15 = vcmp.gt.f32.partialorder %v256_v12, 0.0 }
 0x154   :  { %v236_v14 = vpop.xlane.xlu0 %235 }
 0x155   :  { %v257_v19 = vadd.f32 %v252_v6, %v236_v14  ;;  %v282_v26 = vmul.f32 1.442695, %v272_v16 }
 0x157   :  { %v273_v17 = vmin.f32 %v257_v19, 0.0  ;;  %630 = vpow2.f32 %v282_v26  ;;  %vm265_vm1 = vcmp.gt.f32.partialorder %v257_v19, 0.0 }
 0x158   :  { %v239_v20 = vpop.xlane.xlu1 %238 }
 0x159   :  { %v258_v25 = vadd.f32 %v252_v6, %v239_v20  ;;  %v284_v27 = vmul.f32 1.442695, %v273_v17  ;;  %v627_v41 = vpop.eup %626 }
 0x15a   :  { %v574_v48 = vadd.f32 -1.0, %v627_v41 }
 0x15b   :  { %v274_v28 = vmin.f32 %v258_v25, 0.0  ;;  %632 = vpow2.f32 %v284_v27  ;;  %vm266_vm2 = vcmp.gt.f32.partialorder %v258_v25, 0.0 }
 0x15c   :  { %v302_v57 = vsel %vm262_vm0, %v254_v8, %v574_v48  ;;  %vm546_vm0 = vcmp.eq.s32.totalorder %v799_v21, 6 }
 0x15d   :  { %v242_v29 = vpop.xlane.xlu0 %241  ;;  %v286_v30 = vmul.f32 1.442695, %v274_v28  ;;  %v629_v22 = vpop.eup %628  ;;  %v402_v3 = vrot.slane %v302_v57, %v401_v54 }
 0x15e   :  { %v259_v31 = vadd.f32 %v252_v6, %v242_v29  ;;  %v575_v46 = vadd.f32 -1.0, %v629_v22 }
 0x15f   :  { %634 = vpow2.f32 %v286_v30 }
 0x160   :  { %v275_v32 = vmin.f32 %v259_v31, 0.0  ;;  %v303_v52 = vsel %vm263_vm14, %v255_v10, %v575_v46  ;;  %vm267_vm3 = vcmp.gt.f32.partialorder %v259_v31, 0.0  ;;  %vm529_vm14 = vcmp.lt.s32.totalorder %v799_v21, 6 }
 0x161   :  { %v245_v33 = vpop.xlane.xlu1 %244  ;;  %v631_v44 = vpop.eup %630  ;;  %v406_v60 = vrot.slane %v303_v52, %v401_v54 }
 0x162   :  { %v288_v34 = vmul.f32 1.442695, %v275_v32  ;;  %v260_v35 = vadd.f32 %v252_v6, %v245_v33  ;;  %v576_v47 = vadd.f32 -1.0, %v631_v44 }
 0x163   :  { %v432_v7 = vsel %vm431_vm4, %v406_v60, %v402_v3 }
 0x164   :  { %636 = vpow2.f32 %v288_v34  ;;  %v276_v36 = vmin.f32 %v260_v35, 0.0  ;;  %v304_v55 = vsel %vm264_vm15, %v256_v12, %v576_v47  ;;  %vm268_vm6 = vcmp.gt.f32.partialorder %v260_v35, 0.0 }
 0x165   :  { %v248_v37 = vpop.xlane.xlu0 %247  ;;  %v312_v38 = vpop.permute.xlu1 %311  ;;  %v410_v62 = vrot.slane %v304_v55, %v401_v54  ;;  %vm531_vm15 = vcmask 64512  }
 0x166   :  { %v290_v39 = vmul.f32 1.442695, %v276_v36  ;;  %v261_v40 = vadd.f32 %v252_v6, %v248_v37  ;;  %593 = vmatmul.mubr.msk.f32.vlgmr.msra.gmra.mrb[0].mxu0 %vm315_vm13, %v312_v38  ;;  %v633_v42 = vpop.eup %632  ;;  %vm449_vm13 = vcmask 48128  }
 0x167   :  { %v577_v49 = vadd.f32 -1.0, %v633_v42  ;;  %v434_v9 = vsel %vm433_vm5, %v410_v62, %v432_v7 }
 0x168   :  { %638 = vpow2.f32 %v290_v39  ;;  %v277_v43 = vmin.f32 %v261_v40, 0.0  ;;  %vm269_vm10 = vcmp.gt.f32.partialorder %v261_v40, 0.0 }
 0x169   :  { %v635_v45 = vpop.eup %634  ;;  %v305_v58 = vsel %vm265_vm1, %v257_v19, %v577_v49 }
 0x16a   :  { %v292_v23 = vmul.f32 1.442695, %v277_v43  ;;  %v578_v51 = vadd.f32 -1.0, %v635_v45  ;;  %v414_v56 = vrot.slane %v305_v58, %v401_v54 }
 0x16c   :  { %640 = vpow2.f32 %v292_v23  ;;  %v306_v61 = vsel %vm266_vm2, %v258_v25, %v578_v51  ;;  %v436_v13 = vsel %vm435_vm7, %v414_v56, %v434_v9  ;;  %v527_v25 = vrot.slane %v862_v63, %v74_v11 }
 0x16d   :  { %v418_v5 = vrot.slane %v306_v61, %v401_v54 }
 0x16e   :  { %v637_v50 = vpop.eup %636 }
 0x16f   :  { %v579_v53 = vadd.f32 -1.0, %v637_v50  ;;  %v438_v15 = vsel %vm437_vm8, %v418_v5, %v436_v13 }
 0x171   :  { %v307_v0 = vsel %vm267_vm3, %v259_v31, %v579_v53 }
 0x172   :  { %v639_v59 = vpop.eup %638  ;;  %v422_v8 = vrot.slane %v307_v0, %v401_v54 }
 0x173   :  { %v580_v2 = vadd.f32 -1.0, %v639_v59 }
 0x174   :  { %v440_v16 = vsel %vm439_vm9, %v422_v8, %v438_v15 }
 0x175   :  { %v308_v4 = vsel %vm268_vm6, %v260_v35, %v580_v2 }
 0x176   :  { %v641_v6 = vpop.eup %640  ;;  %v426_v10 = vrot.slane %v308_v4, %v401_v54 }
 0x177   :  { %v581_v12 = vadd.f32 -1.0, %v641_v6 }
 0x178   :  { %v442_v17 = vsel %vm441_vm11, %v426_v10, %v440_v16 }
 0x179   :  { %v309_v14 = vsel %vm269_vm10, %v261_v40, %v581_v12 }
 0x17a   :  { %v430_v19 = vrot.slane %v309_v14, %v401_v54 }
 0x17c   :  { %v444_v18 = vsel %vm443_vm12, %v430_v19, %v442_v17 }
 0x17d   :  { %598 = vmatmul.mubr.msk.f32.vlgmr.msra.gmra.mrb[0].mxu1 %vm449_vm13, %v444_v18 }
 0x239   :  { %v387_v20 = vpop.f32.mrb[0].mxu0 }
 0x23a   :  { %v594_v24 = vpop.f32.mrb[1].mxu0 }
 0x250   :  { %v520_v26 = vpop.f32.mrb[0].mxu1 }
 0x251   :  { %v521_v27 = vadd.f32 %v520_v26, %v387_v20  ;;  %v599_v28 = vpop.f32.mrb[1].mxu1 }
 0x253   :  { %v528_v29 = vadd.f32 %v527_v25, %v521_v27 }
 0x255   :  { %v530_v30 = vsel %vm529_vm14, %v528_v29, -1e+30  ;;  %v547_v40 = vsel %vm546_vm0, %v528_v29, 0.0 }
 0x256   :  { %v532_v31 = vsel %vm531_vm15, %v530_v30, -inf }
 0x257   :  { %533 = vmax.xlane.f32.xlu0 %v532_v31 }
 0x2e4   :  { %v534_v32 = vpop.xlane.xlu0 %533 }
 0x2e5   :  { %v535_v33 = vsub.f32 %v530_v30, %v534_v32 }
 0x2e7   :  { %v536_v34 = vmul.f32 1.442695, %v535_v33 }
 0x2e9   :  { %642 = vpow2.f32 %v536_v34 }
 0x2f3   :  { %v643_v1 = vpop.eup %642 }
 0x2f4   :  { %v538_v11 = vsel %vm531_vm15, %v643_v1, 0.0 }
 0x2f5   :  { %539 = vadd.xlane.f32.xlu0 %v538_v11 }
 0x382   :  { %v540_v63 = vpop.xlane.xlu0 %539 }
 0x383   :  { %644 = vrcp.f32 %v540_v63 }
 0x38d   :  { %v645_v35 = vpop.eup %644 }
 0x38e   :  { %v542_v36 = vmul.f32 %v645_v35, %v540_v63 }
 0x390   :  { %v543_v37 = vsub.f32 2.0, %v542_v36 }
 0x392   :  { %v544_v38 = vmul.f32 %v645_v35, %v543_v37 }
 0x394   :  { %v545_v39 = vmul.f32 %v643_v1, %v544_v38 }
 0x396   :  { %v548_v41 = vsel %vm529_vm14, %v545_v39, %v547_v40 }
 0x397   :  { %549 = vst.msk [vmem:[#allocation7] sm:$0xff] %vm531_vm15, %v548_v41 }
 0x398   :  { %701 = shalt.err (!%p698_p6)
}
 0x399   :  { %s702_s12 = scalar_lea.hbm %s896_s2, 128 }
 0x39a   :  { %p703_p7 = scmp.ne.s32.totalorder %s896_s2, %s702_s12  ;;  %p706_p8 = scmp.lt.u32.totalorder %s702_s12, %s896_s2 }
 0x39c   :  { %p708_p9 = pnand %p706_p8, %p703_p7 }
 0x39e   :  { %711 = shalt.err (!%p708_p9)
}
 0x39f   :  { %559 = dma.vmem_to_hbm [thread:$0]  %s557_s8, 128, %s896_s2, [#allocation4]  }
 0x3a0   :  { %716 = dma.done.wait [#allocation4], 128  }
 0x3a1   :  { %717 = vsyncadd [#allocation4], 4294967168 }
 0x3a2   :  { %563 = vsyncpa [#allocation3], 1 }
 0x3a3   :  { %564 = vsyncpa [#allocation6], 1 }
 0x3a4   :  { %565 = vsyncpa [#allocation4], 1 }

</bundles_post_ra>
